<compile_context>
chip_gen: v6e
topology: v6e:2x2x1
jax: 0.10.0
libtpu: 0.0.40
codegen_flags: <defaults>
</compile_context>

<pallas_src>
import math

import jax
import jax.numpy as jnp
from jax.experimental import pallas as pl
from jax.experimental.pallas import tpu as pltpu

_LANE = 128
_MIN_BLOCK_BYTES = 512 * 1024        # never shrink blocks below this
_MIN_GRID_STEPS = 8                  # keep v7x megacore busy when possible
_BLOCK_BYTE_BUDGET = 8 * 1024 * 1024 # per x-block; 2x(in+out) double-buffered
                                     # stays well inside v7x's 64 MiB VMEM


def build_pe(max_seq_len: int, d_model: int) -> jnp.ndarray:
    """Deterministic sinusoidal table, identical to the PyTorch __init__."""
    position = jnp.arange(max_seq_len, dtype=jnp.float32)[:, None]           # (L, 1)
    div_term = jnp.exp(
        jnp.arange(0, d_model, 2, dtype=jnp.float32) * -(math.log(10000.0) / d_model)
    )                                                                         # (D/2,)
    angles = position * div_term                                              # (L, D/2)
    pe = jnp.zeros((max_seq_len, d_model), dtype=jnp.float32)
    pe = pe.at[:, 0::2].set(jnp.sin(angles))
    pe = pe.at[:, 1::2].set(jnp.cos(angles))
    return pe                                                                 # (L, D)


def prepare_pe(pe: jnp.ndarray, seq_len: int, dtype) -> jnp.ndarray:
    """Slice/cast/flatten the pe buffer once (done at 'module init' time)."""
    d_model = pe.shape[-1]
    return pe[:seq_len, :].astype(dtype).reshape(1, seq_len * d_model)


def _add_pe_kernel(x_ref, pe_ref, o_ref):
    # x_ref / o_ref: (tb, tl); pe_ref: (1, tl) -> sublane-broadcast VPU add.
    o_ref[...] = x_ref[...] + pe_ref[...]


def _pick_tiles(B: int, L: int, dtype) -> tuple[int, int]:
    """Pick (batch_tile, lane_tile) for the flattened (B, L) add."""
    itemsize = jnp.dtype(dtype).itemsize
    sub = max(8, 32 // itemsize)              # native sublane pack: 8/16/32

    # Batch (sublane) tile: full extent when small, else a packed multiple.
    tb = B if B <= 8 * sub else 8 * sub

    # Lane tile from the per-block byte budget, multiple of 128 (ragged grid
    # via cdiv handles non-divisible L); full extent if it already fits.
    tl = max(_LANE, (_BLOCK_BYTE_BUDGET // (itemsize * tb)) // _LANE * _LANE)
    if tl >= L:
        tl = L                                 # full extent is always legal

    # Keep at least _MIN_GRID_STEPS steps so megacore can shard the grid, but
    # never drop below _MIN_BLOCK_BYTES per block (tiny blocks lose roofline).
    while pl.cdiv(L, tl) * pl.cdiv(B, tb) < _MIN_GRID_STEPS:
        new_tl = max(_LANE, (tl // 2) // _LANE * _LANE)
        if new_tl == tl or new_tl * tb * itemsize < _MIN_BLOCK_BYTES:
            break
        tl = new_tl
    return tb, tl


def positional_encoding_forward(x: jnp.ndarray, pe_flat: jnp.ndarray) -> jnp.ndarray:
    """x: (B, S, D); pe_flat: (1, S*D) already sliced/cast (see prepare_pe)."""
    B, S, D = x.shape
    L = S * D
    assert pe_flat.shape == (1, L), (pe_flat.shape, (1, L))

    x2 = x.reshape(B, L)                       # lane-dense layout (free reshape)

    itemsize = jnp.dtype(x.dtype).itemsize
    tb, tl = _pick_tiles(B, L, x.dtype)
    grid = (pl.cdiv(L, tl), pl.cdiv(B, tb))    # batch innermost -> pe resident

    # double-buffered x-in + x-out + pe; cap below v7x's 64 MiB physical VMEM.
    vmem_need = 2 * (2 * tb * tl + tl) * itemsize
    vmem_limit = int(min(max(vmem_need + (8 << 20), 24 << 20), 48 << 20))

    out2 = pl.pallas_call(
        _add_pe_kernel,
        out_shape=jax.ShapeDtypeStruct((B, L), x.dtype),
        grid_spec=pltpu.PrefetchScalarGridSpec(
            num_scalar_prefetch=0,
            grid=grid,
            in_specs=[
                pl.BlockSpec((tb, tl), lambda l, b: (b, l)),   # x tile
                pl.BlockSpec((1, tl), lambda l, b: (0, l)),    # pe tile (reused over b)
            ],
            out_specs=pl.BlockSpec((tb, tl), lambda l, b: (b, l)),
        ),
        compiler_params=pltpu.CompilerParams(
            dimension_semantics=("parallel", "parallel"),
            vmem_limit_bytes=vmem_limit,
        ),
        # NOTE: no input_output_aliases — without jit donation the alias forces
        # a defensive copy of x (2x HBM traffic) and PyTorch is out-of-place.
    )(x2, pe_flat)

    return out2.reshape(B, S, D)


def positional_encoding(x: jnp.ndarray, pe: jnp.ndarray) -> jnp.ndarray:
    """Convenience wrapper mirroring the PyTorch forward (pe = (L, D) buffer)."""
    return positional_encoding_forward(x, prepare_pe(pe, x.shape[1], x.dtype))


if __name__ == "__main__":
    # Module config (small, deterministic)
    max_seq_len = 16
    d_model = 32
    batch, seq = 2, 8

    key = jax.random.PRNGKey(0)
    x = jax.random.normal(key, (batch, seq, d_model), dtype=jnp.float32)

    pe = build_pe(max_seq_len, d_model)            # __init__ buffer
    pe_flat = prepare_pe(pe, seq, x.dtype)         # precomputed once, not per call

    # Reference: same math as the PyTorch forward.
    ref = x + pe[None, :seq, :].astype(x.dtype)

    fwd = jax.jit(positional_encoding_forward)
    out = jax.block_until_ready(fwd(x, pe_flat))

    assert out.shape == ref.shape and out.dtype == ref.dtype
    assert jnp.allclose(out, ref, atol=1e-6), "mismatch vs reference"

    print("KERNEL_OK")
</pallas_src>

<mosaic_0001>
module attributes {stable_mosaic.version = 11 : i64} {
  func.func @_add_pe_kernel(%arg0: i32, %arg1: i32, %arg2: memref<2x256xf32, #tpu.memory_space<vmem>>, %arg3: memref<1x256xf32, #tpu.memory_space<vmem>>, %arg4: memref<2x256xf32, #tpu.memory_space<vmem>>) attributes {dimension_semantics = [#tpu.dimension_semantics<parallel>, #tpu.dimension_semantics<parallel>], iteration_bounds = array<i64: 1, 1>, scalar_prefetch = 0 : i64, scratch_operands = 0 : i64, tpu.core_type = #tpu.core_type<tc>, window_params = [{transform_indices = @transform_0, window_bounds = array<i64: 2, 256>}, {transform_indices = @transform_1, window_bounds = array<i64: 1, 256>}, {transform_indices = @transform_2, window_bounds = array<i64: 2, 256>}]} {
    %c0 = arith.constant 0 : index
    %c0_0 = arith.constant 0 : index
    %0 = vector.load %arg2[%c0, %c0_0] : memref<2x256xf32, #tpu.memory_space<vmem>>, vector<2x256xf32>
    %c0_1 = arith.constant 0 : index
    %c0_2 = arith.constant 0 : index
    %1 = vector.load %arg3[%c0_1, %c0_2] : memref<1x256xf32, #tpu.memory_space<vmem>>, vector<1x256xf32>
    %2 = vector.broadcast %1 : vector<1x256xf32> to vector<2x256xf32>
    %3 = arith.addf %0, %2 : vector<2x256xf32>
    %c0_3 = arith.constant 0 : index
    %c0_4 = arith.constant 0 : index
    %4 = vector.load %arg4[%c0_3, %c0_4] : memref<2x256xf32, #tpu.memory_space<vmem>>, vector<2x256xf32>
    tpu.vector_store %arg4[%c0_3, %c0_4], %3 {strides = array<i32>} : memref<2x256xf32, #tpu.memory_space<vmem>>, vector<2x256xf32>,
    return
  }
  func.func @transform_0(%arg0: i32, %arg1: i32) -> (i32, i32) {
    %c0_i32 = arith.constant 0 : i32
    return %arg1, %arg0 : i32, i32
  }
  func.func @transform_1(%arg0: i32, %arg1: i32) -> (i32, i32) {
    %c0_i32 = arith.constant 0 : i32
    %c0_i32_0 = arith.constant 0 : i32
    return %c0_i32, %arg0 : i32, i32
  }
  func.func @transform_2(%arg0: i32, %arg1: i32) -> (i32, i32) {
    %c0_i32 = arith.constant 0 : i32
    return %arg1, %arg0 : i32, i32
  }
}

</mosaic_0001>

<bundles_post_ra>
// kernel: positional_encoding_forward.1
= control target key start
LH: loop header
LB: loop body
LE: loop exit
PB: predicated region body
PF: predicated region fallthrough
CT: control target
= control target key end

     0   :  { %v14_v0 = vlaneseq  ;;  %v38_v1 = vmov 1983009808   ;;  %s63_s1 = inlined_call_operand.vmem [shape: f32[1,256], index: 1, kind: input, shape index: {}]   ;;  %s64_s0 = inlined_call_operand.vmem [shape: f32[2,256], index: 0, kind: input, shape index: {}]   ;;  %s65_s2 = inlined_call_operand.vmem [shape: f32[2,256], index: 2, kind: output, shape index: {}]  }
   0x1   :  { %v24_v2 = vunpack.c.l.s4 %v38_v1  ;;  %v12_v4 = vld [vmem:[%s63_s1] sm:$0x3] }
   0x2   :  { %v15_v3 = vshrl.u32 %v14_v0, 7  ;;  %v11_v12 = vld [vmem:[%s64_s0] sm:$0xf] }
   0x3   :  { %v25_v5 = vunpack.c.0.s8 %v24_v2 }
   0x4   :  { %v16_v6 = vsub.s32 0, %v15_v3  ;;  %v20_v7 = vsub.s32 1, %v15_v3 }
   0x5   :  { %v28_v10 = vsub.s32 %v25_v5, %v15_v3 }
   0x6   :  { %v17_v8 = vrot.slane %v12_v4, %v16_v6  ;;  %v21_v9 = vrot.slane %v12_v4, %v20_v7 }
   0x8   :  { %v22_v11 = vcombine.low %v17_v8, %v21_v9 }
   0xa   :  { %v29_v13 = vrot.slane %v22_v11, %v28_v10 }
   0xc   :  { %v31_v14 = vadd.f32 %v29_v13, %v11_v12 }
   0xe   :  { %32 = vst [vmem:[%s65_s2] sm:$0xf] %v31_v14 }

</bundles_post_ra>
